<compile_context>
chip_gen: v7x
topology: tpu7x:2x2x1
jax: 0.10.0
libtpu: 0.0.40
codegen_flags: <defaults>
</compile_context>

<pallas_src>
import functools

import jax
import jax.numpy as jnp
from jax.experimental import pallas as pl
from jax.experimental.pallas import tpu as pltpu


def make_positional_table(num_hiddens: int, max_len: int = 1000,
                          dtype=jnp.float32) -> jnp.ndarray:
    """Builds P exactly as the PyTorch __init__ does, shape (1, max_len, H)."""
    pos = jnp.arange(max_len, dtype=jnp.float32).reshape(-1, 1)
    div = jnp.power(
        10000.0,
        jnp.arange(0, num_hiddens, 2, dtype=jnp.float32) / num_hiddens,
    )
    X = pos / div  # (max_len, ceil(H/2))

    n_even = num_hiddens // 2 + num_hiddens % 2  # even (0::2) slots
    n_odd = num_hiddens // 2                     # odd  (1::2) slots

    P = jnp.zeros((1, max_len, num_hiddens), dtype=jnp.float32)
    P = P.at[:, :, 0::2].set(jnp.sin(X[:, :n_even])[None])
    P = P.at[:, :, 1::2].set(jnp.cos(X[:, :n_odd])[None])
    return P.astype(dtype)


def _pe_add_kernel(x_ref, p_ref, o_ref):
    # x_ref: (TB, TC) tile of flattened X; p_ref: (1, TC) tile of flattened P
    # (broadcast across the sublane/batch axis).
    o_ref[...] = (x_ref[...] + p_ref[...]).astype(o_ref.dtype)


def _vmem_budget_bytes() -> int:
    """Per-generation VMEM budget with headroom (v5e/v6e: 128 MiB, v7x: 64 MiB)."""
    cap = None
    try:
        cap = getattr(pltpu.get_tpu_info(), "vmem_capacity_bytes", None)
    except Exception:
        cap = None
    if not cap or cap <= 0:
        cap = 64 * 1024 * 1024  # conservative fallback: v7x per-TC physical VMEM
    return (3 * int(cap)) // 4  # leave headroom for Mosaic-internal scratch


def _choose_tiles(B: int, N: int, itemsize: int, target_tile_bytes: int):
    """Pick (row, col) tile sizes.

    Columns (lanes) are grown first toward ~target_tile_bytes: x2 is (B, N)
    row-major, so each DMA row-run is TC*itemsize contiguous; wider TC means
    longer contiguous HBM bursts.  TB stays at the dtype sublane pack unless a
    single column block covers the whole row, in which case (TB, N) tiles are
    fully contiguous and taller tiles amortize per-grid-step overhead.
    """
    LANE = 128
    pack = max(8, 32 // max(1, itemsize))  # 8 f32 / 16 bf16 / 32 int8-fp8

    # Column (lane) tile.
    if N <= LANE:
        TC = N                                            # full extent (legal block)
    else:
        tc_cap = max(LANE,
                     (target_tile_bytes // (pack * itemsize)) // LANE * LANE)
        TC = min((N // LANE) * LANE, tc_cap)              # multiple of 128, <= N

    # Row (sublane) tile.
    if B <= pack:
        TB = B                                            # full extent (legal block)
    else:
        TB = pack
        if TC >= N:  # whole row in one column block -> fully contiguous tiles
            rows_fit = (target_tile_bytes // max(1, N * itemsize)) // pack * pack
            TB = max(pack, min((B // pack) * pack, rows_fit))
    return TB, TC


def positional_encoding_forward(x: jnp.ndarray, p_flat: jnp.ndarray) -> jnp.ndarray:
    """x: (B, S, H); p_flat: (1, max_len*H) already in x.dtype. Returns x + P."""
    B, S, H = x.shape
    N = S * H
    if N > p_flat.shape[1]:
        raise ValueError(f"sequence length {S} exceeds max_len "
                         f"{p_flat.shape[1] // H}")

    dtype = x.dtype
    itemsize = jnp.dtype(dtype).itemsize
    x2 = x.reshape(B, N)  # lane-dense flattening (bitcast under jit)

    budget = _vmem_budget_bytes()
    target_tile_bytes = min(8 * 1024 * 1024, max(1 << 20, budget // 6))
    TB, TC = _choose_tiles(B, N, itemsize, target_tile_bytes)
    ncol = pl.cdiv(N, TC)
    nrow = pl.cdiv(B, TB)

    # P input: pass the full flattened table whenever the block shape is legal
    # on it (TC multiple of 128), so no per-call slice/copy is launched.
    # Only for tiny non-128-multiple N do we take a (cheap) full-extent slice.
    if TC % 128 == 0:
        p_in = p_flat
    else:
        p_in = jax.lax.slice(p_flat, (0, 0), (1, N))

    # Double-buffered X tile + out tile + P tile, plus headroom.
    needed = (4 * TB * TC + 4 * TC) * itemsize
    vmem_limit = int(min(budget, max(needed + (4 << 20), 16 << 20)))

    cost = pl.CostEstimate(
        flops=B * N,
        transcendentals=0,
        bytes_accessed=(2 * B * N + N) * itemsize,  # read X, write out, read P once
    )

    out2 = pl.pallas_call(
        _pe_add_kernel,
        out_shape=jax.ShapeDtypeStruct((B, N), dtype),
        grid_spec=pl.GridSpec(
            # Columns outer, rows inner: P's block index only changes on the
            # outer axis, so its tile stays resident across the inner loop.
            grid=(ncol, nrow),
            in_specs=[
                pl.BlockSpec((TB, TC), lambda j, i: (i, j)),  # X tile
                pl.BlockSpec((1, TC), lambda j, i: (0, j)),   # P tile (batch-broadcast)
            ],
            out_specs=pl.BlockSpec((TB, TC), lambda j, i: (i, j)),
        ),
        input_output_aliases={0: 0},  # in-place add (x is donated at the jit boundary)
        compiler_params=pltpu.CompilerParams(
            dimension_semantics=("parallel", "parallel"),
            vmem_limit_bytes=vmem_limit,
        ),
        cost_estimate=cost,
    )(x2, p_in)

    return out2.reshape(B, S, H)


# Donate x so the aliased pallas output truly reuses its HBM buffer.
_pe_forward = jax.jit(positional_encoding_forward, donate_argnums=(0,))


class PositionalEncodingPallas:
    """Pallas equivalent of the PyTorch PositionalEncoding module (eval mode)."""

    def __init__(self, num_hiddens: int, dropout: float, max_len: int = 1000):
        self.num_hiddens = num_hiddens
        self.dropout = dropout  # eval-mode identity; TODO(synk): training dropout
        self.max_len = max_len
        self.P = make_positional_table(num_hiddens, max_len)  # (1, max_len, H) f32
        self._p_flat_cache = {}  # dtype-name -> (1, max_len*H) table in that dtype

    def _flat_table(self, dtype) -> jnp.ndarray:
        key = jnp.dtype(dtype).name
        if key not in self._p_flat_cache:
            self._p_flat_cache[key] = (
                self.P.astype(dtype).reshape(1, self.max_len * self.num_hiddens)
            )
        return self._p_flat_cache[key]

    def __call__(self, x: jnp.ndarray) -> jnp.ndarray:
        return _pe_forward(x, self._flat_table(x.dtype))


if __name__ == "__main__":
    num_hiddens = 32
    max_len = 1000
    dropout_rate = 0.1  # unused at eval time (identity)

    pe = PositionalEncodingPallas(num_hiddens, dropout_rate, max_len)

    key = jax.random.PRNGKey(0)
    k1, k2 = jax.random.split(key)

    # Test 1: the module's nominal small shapes.
    batch, seq = 2, 8
    x1 = jax.random.normal(k1, (batch, seq, num_hiddens), dtype=jnp.float32)
    ref1 = jax.block_until_ready(x1 + pe.P[:, :seq, :])  # before donation of x1
    out1 = jax.block_until_ready(pe(x1))
    assert out1.shape == (batch, seq, num_hiddens)
    assert jnp.allclose(out1, ref1, atol=1e-6, rtol=1e-6)

    # Test 2: batch not a multiple of the sublane pack and longer sequence
    # (exercises partial row blocks + resident P tile across row steps).
    b2, s2 = 12, 64
    x2 = jax.random.normal(k2, (b2, s2, num_hiddens), dtype=jnp.float32)
    ref2 = jax.block_until_ready(x2 + pe.P[:, :s2, :])
    out2 = jax.block_until_ready(pe(x2))
    assert out2.shape == (b2, s2, num_hiddens)
    assert jnp.allclose(out2, ref2, atol=1e-6, rtol=1e-6)

    print("KERNEL_OK")
</pallas_src>

<mosaic_0001>
module attributes {stable_mosaic.version = 11 : i64} {
  func.func @_pe_add_kernel(%arg0: i32, %arg1: i32, %arg2: memref<2x256xf32, #tpu.memory_space<vmem>>, %arg3: memref<1x256xf32, #tpu.memory_space<vmem>>, %arg4: memref<2x256xf32, #tpu.memory_space<vmem>>) attributes {dimension_semantics = [#tpu.dimension_semantics<parallel>, #tpu.dimension_semantics<parallel>], iteration_bounds = array<i64: 1, 1>, scalar_prefetch = 0 : i64, scratch_operands = 0 : i64, tpu.core_type = #tpu.core_type<tc>, window_params = [{transform_indices = @transform_0, window_bounds = array<i64: 2, 256>}, {transform_indices = @transform_1, window_bounds = array<i64: 1, 256>}, {transform_indices = @transform_2, window_bounds = array<i64: 2, 256>}]} {
    %c0 = arith.constant 0 : index
    %c0_0 = arith.constant 0 : index
    %0 = vector.load %arg2[%c0, %c0_0] : memref<2x256xf32, #tpu.memory_space<vmem>>, vector<2x256xf32>
    %c0_1 = arith.constant 0 : index
    %c0_2 = arith.constant 0 : index
    %1 = vector.load %arg3[%c0_1, %c0_2] : memref<1x256xf32, #tpu.memory_space<vmem>>, vector<1x256xf32>
    %2 = vector.broadcast %1 : vector<1x256xf32> to vector<2x256xf32>
    %3 = arith.addf %0, %2 : vector<2x256xf32>
    %c0_3 = arith.constant 0 : index
    %c0_4 = arith.constant 0 : index
    %4 = vector.load %arg4[%c0_3, %c0_4] : memref<2x256xf32, #tpu.memory_space<vmem>>, vector<2x256xf32>
    tpu.vector_store %arg4[%c0_3, %c0_4], %3 {strides = array<i32>} : memref<2x256xf32, #tpu.memory_space<vmem>>, vector<2x256xf32>,
    return
  }
  func.func @transform_0(%arg0: i32, %arg1: i32) -> (i32, i32) {
    %c0_i32 = arith.constant 0 : i32
    return %arg1, %arg0 : i32, i32
  }
  func.func @transform_1(%arg0: i32, %arg1: i32) -> (i32, i32) {
    %c0_i32 = arith.constant 0 : i32
    %c0_i32_0 = arith.constant 0 : i32
    return %c0_i32, %arg0 : i32, i32
  }
  func.func @transform_2(%arg0: i32, %arg1: i32) -> (i32, i32) {
    %c0_i32 = arith.constant 0 : i32
    return %arg1, %arg0 : i32, i32
  }
}

</mosaic_0001>

<bundles_post_ra>
// kernel: positional_encoding_forward.1
= control target key start
LH: loop header
LB: loop body
LE: loop exit
PB: predicated region body
PF: predicated region fallthrough
CT: control target
= control target key end

     0   :  { %7 = vsyncpa [#allocation3], 0  ;;  %s76_s9 = smov [#allocation2]   ;;  %s114_s0 = inlined_call_operand.vmem [shape: f32[2,256], index: 0, kind: input, shape index: {}, may-alias: {0,2}]   ;;  %s115_s1 = inlined_call_operand.hbm [shape: f32[1,32000], index: 1, kind: input, shape index: {}]   ;;  %s116_s2 = inlined_call_operand.vmem [shape: f32[2,256], index: 2, kind: output, shape index: {}, may-alias: {0,2}]  }
   0x1   :  { %s16_s10 = sshll.u32 %s76_s9, 4  ;;  %s52_s13 = scalar_lea.hbm %s115_s1, 32  ;;  %s17_s10 = int_to_ptr.vmem [resolvable:$true] %s16_s10 }
   0x2   :  { %p53_p0 = scmp.ne.s32.totalorder %s115_s1, %s52_s13  ;;  %s54_s18 = scalar_lea.hbm %s115_s1, 4000 }
   0x3   :  { %p55_p1 = scmp.lt.u32.totalorder %s54_s18, %s52_s13  ;;  %p56_p2 = scmp.lt.u32.totalorder %s52_s13, %s115_s1 }
   0x5   :  { %p57_p3 = por %p56_p2, %p55_p1 }
   0x7   :  { %p58_p4 = pnand %p57_p3, %p53_p0 }
   0x9   :  { %61 = shalt.err (!%p58_p4)
}
   0xa   :  { %s62_s21 = scalar_lea.vmem %s17_s10, 32  ;;  %p67_p6 = scmp.lt.s32.totalorder %s17_s10, %s17_s10 }
   0xb   :  { %p63_p5 = scmp.ne.s32.totalorder %s17_s10, %s62_s21  ;;  %p68_p7 = scmp.lt.s32.totalorder %s62_s21, %s62_s21 }
   0xd   :  { %p69_p8 = por %p68_p7, %p67_p6 }
   0xf   :  { %p70_p9 = pnand %p69_p8, %p63_p5 }
  0x11   :  { %73 = shalt.err (!%p70_p9)
}
  0x12   :  { %19 = dma.hbm_to_vmem [thread:$0]  %s115_s1, 32, %s17_s10, [#allocation3]  }
  0x13   :  { %74 = dma.done.wait [#allocation3], 32  }
  0x14   :  { %75 = vsyncadd [#allocation3], 4294967264  ;;  %v26_v0 = vlaneseq  ;;  %v77_v1 = vmov 1983009808   ;;  %v24_v7 = vld [vmem:[#allocation2] sm:$0x3] }
  0x15   :  { %v36_v2 = vunpack.c.l.s4 %v77_v1  ;;  %v23_v12 = vld [vmem:[%s114_s0] sm:$0xf] }
  0x16   :  { %v27_v3 = vshrl.u32 %v26_v0, 7 }
  0x17   :  { %v37_v6 = vunpack.c.0.s8 %v36_v2 }
  0x18   :  { %v28_v4 = vsub.s32 0, %v27_v3  ;;  %v32_v5 = vsub.s32 1, %v27_v3 }
  0x19   :  { %v40_v10 = vsub.s32 %v37_v6, %v27_v3 }
  0x1a   :  { %v29_v8 = vrot.slane %v24_v7, %v28_v4  ;;  %v33_v9 = vrot.slane %v24_v7, %v32_v5 }
  0x1c   :  { %v34_v11 = vcombine.low %v29_v8, %v33_v9 }
  0x1e   :  { %v41_v13 = vrot.slane %v34_v11, %v40_v10 }
  0x20   :  { %v43_v14 = vadd.f32 %v41_v13, %v23_v12 }
  0x22   :  { %44 = vst [vmem:[%s116_s2] sm:$0xf] %v43_v14 }
  0x23   :  { %49 = vsyncpa [#allocation3], 1 }

</bundles_post_ra>
